<compile_context>
chip_gen: v6e
topology: v6e:2x2x1
jax: 0.10.0
libtpu: 0.0.40
codegen_flags: <defaults>
</compile_context>

<pallas_src>
import functools

import jax
import jax.numpy as jnp
from jax.experimental import pallas as pl
from jax.experimental.pallas import tpu as pltpu


def _round_up(a, b):
    return (a + b - 1) // b * b


def _matmul_bias_lrelu_kernel(p_ref, w_ref, b_ref, o_ref, *, slope):
    # p_ref : (TM, K)      bf16 im2col patch tile      (K = KH*KW*Cin)
    # w_ref : (K, Cpad)    bf16 reshaped/padded weights
    # b_ref : (1, Cpad)    f32 bias (zero-padded)
    # o_ref : (TM, Cpad)   output tile (lane-dense, Cpad multiple of 128)
    acc = jnp.dot(p_ref[...], w_ref[...], preferred_element_type=jnp.float32)
    acc = acc + b_ref[...]                              # f32 epilogue
    out = jnp.where(acc >= 0, acc, slope * acc)         # LeakyReLU(0.01)
    o_ref[...] = out.astype(o_ref.dtype)


def nonorm_conv2d(x_nchw, weight_oihw, bias, *, stride=1, padding=1,
                  slope=0.01, tm=256, mxu_dtype=jnp.bfloat16):
    """Conv2d(cin, cout, k, stride, padding) followed by LeakyReLU(0.01).

    x_nchw      : (N, Cin, H, W)      -- PyTorch NCHW convention
    weight_oihw : (Cout, Cin, KH, KW) -- PyTorch OIHW convention
    bias        : (Cout,)
    returns     : (N, Cout, Ho, Wo)
    """
    N, Cin, H, W = x_nchw.shape
    Cout, _, KH, KW = weight_oihw.shape
    S = stride
    Ho = (H + 2 * padding - KH) // S + 1
    Wo = (W + 2 * padding - KW) // S + 1
    K = KH * KW * Cin

    # ---- wrapper glue: layout + im2col (plain JAX) -------------------------------
    x_nhwc = jnp.transpose(x_nchw, (0, 2, 3, 1))                       # (N,H,W,Cin)
    x_pad = jnp.pad(x_nhwc, ((0, 0), (padding, padding), (padding, padding), (0, 0)))

    cols = []
    for kh in range(KH):
        for kw in range(KW):
            cols.append(x_pad[:, kh:kh + (Ho - 1) * S + 1:S,
                                 kw:kw + (Wo - 1) * S + 1:S, :])       # (N,Ho,Wo,Cin)
    # (kh, kw, cin) ordering along the last axis -> matches HWIO weight flattening.
    patches = jnp.concatenate(cols, axis=-1).reshape(N * Ho * Wo, K)

    M = N * Ho * Wo
    TM = min(tm, _round_up(M, 8))
    M_pad = _round_up(M, TM)
    Cpad = max(128, _round_up(Cout, 128))

    patches = jnp.pad(patches, ((0, M_pad - M), (0, 0))).astype(mxu_dtype)

    w2 = jnp.transpose(weight_oihw, (2, 3, 1, 0)).reshape(K, Cout)     # (K, Cout)
    w2 = jnp.pad(w2, ((0, 0), (0, Cpad - Cout))).astype(mxu_dtype)     # (K, Cpad)
    b2 = jnp.pad(bias.astype(jnp.float32), (0, Cpad - Cout)).reshape(1, Cpad)

    kernel = functools.partial(_matmul_bias_lrelu_kernel, slope=slope)

    out_pad = pl.pallas_call(
        kernel,
        out_shape=jax.ShapeDtypeStruct((M_pad, Cpad), x_nchw.dtype),
        grid_spec=pltpu.PrefetchScalarGridSpec(
            num_scalar_prefetch=0,
            grid=(M_pad // TM,),
            in_specs=[
                pl.BlockSpec((TM, K), lambda m: (m, 0)),       # patch tile
                pl.BlockSpec((K, Cpad), lambda m: (0, 0)),     # weights (resident)
                pl.BlockSpec((1, Cpad), lambda m: (0, 0)),     # bias    (resident)
            ],
            out_specs=pl.BlockSpec((TM, Cpad), lambda m: (m, 0)),
        ),
        compiler_params=pltpu.CompilerParams(
            dimension_semantics=("parallel",)),
    )(patches, w2, b2)

    out = out_pad[:M, :Cout].reshape(N, Ho, Wo, Cout)
    return jnp.transpose(out, (0, 3, 1, 2))                            # (N,Cout,Ho,Wo)


if __name__ == "__main__":
    # Module config: nonorm_Conv2d(cin, cout, kernel_size, stride, padding)
    cin, cout, k, stride, padding = 4, 8, 3, 1, 1
    N, H, W = 2, 16, 16

    key = jax.random.PRNGKey(0)
    kx, kwt, kb = jax.random.split(key, 3)

    x = jax.random.normal(kx, (N, cin, H, W), dtype=jnp.float32)
    weight = jax.random.normal(kwt, (cout, cin, k, k), dtype=jnp.float32) * 0.1
    bias = jax.random.normal(kb, (cout,), dtype=jnp.float32) * 0.1

    out = nonorm_conv2d(x, weight, bias, stride=stride, padding=padding)
    out = jax.block_until_ready(out)
    assert out.shape == (N, cout, H, W)

    # Tight reference: same bf16 operand rounding, f32 accumulation.
    ref_bf16 = jax.lax.conv_general_dilated(
        x.astype(jnp.bfloat16), weight.astype(jnp.bfloat16),
        window_strides=(stride, stride),
        padding=[(padding, padding), (padding, padding)],
        dimension_numbers=("NCHW", "OIHW", "NCHW"),
        preferred_element_type=jnp.float32)
    ref_bf16 = ref_bf16 + bias.reshape(1, cout, 1, 1)
    ref_bf16 = jnp.where(ref_bf16 >= 0, ref_bf16, 0.01 * ref_bf16)
    assert jnp.allclose(out, ref_bf16, atol=2e-3, rtol=2e-3)

    # Loose check against the full-f32 module semantics (bf16 MXU operand rounding).
    ref_f32 = jax.lax.conv_general_dilated(
        x, weight, window_strides=(stride, stride),
        padding=[(padding, padding), (padding, padding)],
        dimension_numbers=("NCHW", "OIHW", "NCHW"))
    ref_f32 = ref_f32 + bias.reshape(1, cout, 1, 1)
    ref_f32 = jnp.where(ref_f32 >= 0, ref_f32, 0.01 * ref_f32)
    assert jnp.allclose(out, ref_f32, atol=5e-2, rtol=5e-2)

    print("KERNEL_OK")
</pallas_src>

<mosaic_0001>
module attributes {stable_mosaic.version = 11 : i64} {
  func.func @_matmul_bias_lrelu_kernel(%arg0: i32, %arg1: memref<256x36xbf16, #tpu.memory_space<vmem>>, %arg2: memref<36x128xbf16, #tpu.memory_space<vmem>>, %arg3: memref<1x128xf32, #tpu.memory_space<vmem>>, %arg4: memref<256x128xf32, #tpu.memory_space<vmem>>) attributes {dimension_semantics = [#tpu.dimension_semantics<parallel>], iteration_bounds = array<i64: 2>, scalar_prefetch = 0 : i64, scratch_operands = 0 : i64, tpu.core_type = #tpu.core_type<tc>, window_params = [{transform_indices = @transform_0, window_bounds = array<i64: 256, 36>}, {pipeline_mode = #tpu.pipeline_mode<synchronous>, transform_indices = @transform_1, window_bounds = array<i64: 36, 128>}, {pipeline_mode = #tpu.pipeline_mode<synchronous>, transform_indices = @transform_2, window_bounds = array<i64: 1, 128>}, {transform_indices = @transform_3, window_bounds = array<i64: 256, 128>}]} {
    %c0 = arith.constant 0 : index
    %c0_0 = arith.constant 0 : index
    %0 = vector.load %arg1[%c0, %c0_0] : memref<256x36xbf16, #tpu.memory_space<vmem>>, vector<256x36xbf16>
    %c0_1 = arith.constant 0 : index
    %c0_2 = arith.constant 0 : index
    %1 = vector.load %arg2[%c0_1, %c0_2] : memref<36x128xbf16, #tpu.memory_space<vmem>>, vector<36x128xbf16>
    %cst = arith.constant dense<0.000000e+00> : vector<256x128xf32>
    %2 = tpu.matmul %0, %1, %cst {dimension_numbers = #tpu.dot_dimension_numbers<[1], [0], [0], [1], [0, 0, 1, 1], [], []>} : vector<256x36xbf16>, vector<36x128xbf16>, vector<256x128xf32> -> vector<256x128xf32>
    %c0_3 = arith.constant 0 : index
    %c0_4 = arith.constant 0 : index
    %3 = vector.load %arg3[%c0_3, %c0_4] : memref<1x128xf32, #tpu.memory_space<vmem>>, vector<1x128xf32>
    %4 = vector.broadcast %3 : vector<1x128xf32> to vector<256x128xf32>
    %5 = arith.addf %2, %4 : vector<256x128xf32>
    %cst_5 = arith.constant 0.000000e+00 : f32
    %6 = vector.broadcast %cst_5 : f32 to vector<256x128xf32>
    %7 = arith.cmpf oge, %5, %6 : vector<256x128xf32>
    %cst_6 = arith.constant 0.00999999977 : f32
    %8 = vector.broadcast %cst_6 : f32 to vector<256x128xf32>
    %9 = arith.mulf %8, %5 : vector<256x128xf32>
    %10 = arith.select %7, %5, %9 : vector<256x128xi1>, vector<256x128xf32>
    %c0_7 = arith.constant 0 : index
    %c0_8 = arith.constant 0 : index
    %11 = vector.load %arg4[%c0_7, %c0_8] : memref<256x128xf32, #tpu.memory_space<vmem>>, vector<256x128xf32>
    tpu.vector_store %arg4[%c0_7, %c0_8], %10 {strides = array<i32>} : memref<256x128xf32, #tpu.memory_space<vmem>>, vector<256x128xf32>,
    return
  }
  func.func @transform_0(%arg0: i32) -> (i32, i32) {
    %c0_i32 = arith.constant 0 : i32
    %c0_i32_0 = arith.constant 0 : i32
    return %arg0, %c0_i32 : i32, i32
  }
  func.func @transform_1(%arg0: i32) -> (i32, i32) {
    %c0_i32 = arith.constant 0 : i32
    %c0_i32_0 = arith.constant 0 : i32
    %c0_i32_1 = arith.constant 0 : i32
    return %c0_i32, %c0_i32_0 : i32, i32
  }
  func.func @transform_2(%arg0: i32) -> (i32, i32) {
    %c0_i32 = arith.constant 0 : i32
    %c0_i32_0 = arith.constant 0 : i32
    %c0_i32_1 = arith.constant 0 : i32
    return %c0_i32, %c0_i32_0 : i32, i32
  }
  func.func @transform_3(%arg0: i32) -> (i32, i32) {
    %c0_i32 = arith.constant 0 : i32
    %c0_i32_0 = arith.constant 0 : i32
    return %arg0, %c0_i32 : i32, i32
  }
}

</mosaic_0001>

<bundles_post_ra>
// kernel: tpu_custom_call.1
= control target key start
LH: loop header
LB: loop body
LE: loop exit
PB: predicated region body
PF: predicated region fallthrough
CT: control target
= control target key end

     0   :  { %8 = vsyncpa [#allocation3], 0  ;;  %s1209_s0 = inlined_call_operand.vmem [shape: bf16[512,36], index: 0, kind: input, shape index: {}]   ;;  %s1210_s1 = inlined_call_operand.vmem [shape: bf16[36,128], index: 1, kind: input, shape index: {}]   ;;  %s1211_s2 = inlined_call_operand.vmem [shape: f32[1,128], index: 2, kind: input, shape index: {}]   ;;  %s1212_s3 = inlined_call_operand.hbm [shape: f32[512,128], index: 3, kind: output, shape index: {}]  }
   0x1   :  { %10 = vsyncpa [#allocation3 + $0x1], 0  ;;  %s989_s12 = smov 0   ;;  %s991_s13 = smov 0  }
   0x2   :  { %s993_s14 = smov 0   ;;  %s995_s15 = smov 0  }
   0x3 LB: > { %s1010_s16 = sadd.s32 4294967295, %s964_s15   ;;  %s730_s17 = sadd.s32 4294967294, %s964_s15   ;;  %s964_s15 = sphi %s995_s15, %s1218_s15   ;;  %s960_s14 = sphi %s993_s14, %s1217_s14   ;;  %s956_s13 = sphi %s991_s13, %s1216_s13   ;;  %s952_s12 = sphi %s989_s12, %s1215_s12  }
   0x4   : > { %s1014_s18 = sadd.s32 1, %s964_s15   ;;  %s91_s19 = sadd.s32 1, %s960_s14 }
   0x5   : > { %s88_s20 = ssub.s32 %s964_s15, %s1014_s18  ;;  %p101_p0 = scmp.ne.s32.totalorder %s960_s14, %s956_s13 }
   0x6   : > { %p89_p1 = scmp.eq.s32.totalorder %s88_s20, 0  ;;  %p102_p2 = scmp.eq.s32.totalorder %s1010_s16, 1 }
   0x7   : > { %p107_p3 = scmp.ne.s32.totalorder %s956_s13, %s952_s12  ;;  %p108_p4 = scmp.eq.s32.totalorder %s730_s17, 1 }
   0x8   : > { %s1025_s21 = scalar_select %p89_p1, %s960_s14, %s91_s19  }
   0x9   : > { %p1027_p5 = por %p102_p2, %p101_p0  ;;  %p1031_p6 = por %p108_p4, %p107_p3 }
   0xa   : > { %p733_p7 = scmp.ge.s32.totalorder %s964_s15, 1  ;;  %p141_p8 = scmp.lt.s32.totalorder %s964_s15, 3 }
   0xc   : > { %p142_p9 = pnand %p733_p7, %p141_p8 }
   0xd   : > { %s735_s28 = sshll.u32 (!%p142_p9), %s1010_s16, 5  ;;  %s162_s8 = sand.u32 (!%p142_p9), 1, %s956_s13  }
   0xe   : > { %145 = sbr.rel (%p142_p9) target bundleno = 275 (0x113), region = 32  ;;  %p166_p10 = scmp.lt.s32.totalorder (!%p142_p9), %s735_s28, 63 }
   0xf   : > { %s734_s11 = sshll.u32 (!%p142_p9), %s162_s8, 8  ;;  %s778_s19 = sshll.u32 (!%p142_p9), %s1010_s16, 12 }
  0x10   : > { %s1098_s17 = scalar_lea.vmem (!%p142_p9), [#allocation2], %s734_s11  ;;  %s1161_s25 = scalar_lea.hbm (!%p142_p9), %s1212_s3, %s778_s19 }
  0x11   : > { %s668_s20 = sshll.u32 (!%p142_p9), %s1098_s17, 4  ;;  %s1169_s26 = scalar_lea.sflag (!%p142_p9), [#allocation3], %s162_s8  ;;  %s1163_s20 = int_to_ptr.vmem [resolvable:$true] %s668_s20 }
  0x12   : > { %s904_s27 = scalar_lea.vmem (!%p142_p9), %s1163_s20, 4096 }
  0x13   : > { %v885_v0 = vld [vmem:[%s1210_s1 + $0x10] ss:$0 sps:$4 sm:$0x33]   ;;  %vm361_vm0 = vcmask 1041408   ;;  %v886_v1 = vld [vmem:[%s1210_s1 + $0x8] sm:$0xff]   ;;  %v887_v3 = vld [vmem:[%s1210_s1] sm:$0xff]   ;;  %p905_p11 = scmp.ne.s32.totalorder %s1163_s20, %s904_s27 }
  0x14   : > { %842 = vmatprep.subr.msk.bf16.mxu0 %vm361_vm0, %v885_v0  ;;  %843 = vmatprep.subr.msk.bf16.mxu1 %vm361_vm0, %v885_v0  ;;  %v363_v2 = vsel %vm361_vm0, %v885_v0, 0  ;;  %s1220_s28 = smov (!%p166_p10, %s735_s28), 63  ;;  %vm312_vm1 = vcmask 293888   ;;  %v1088_v20 = vld [vmem:[%s1211_s2] ss:$0 sm:$0xff] }
  0x15   : > { %799 = vmatpush3.bf16.msra.mxu0 %v363_v2  ;;  %839 = vmatpush3.bf16.msra.mxu1 %v363_v2  ;;  %s736_s4 = sshll.u32 %s1220_s28, 2  ;;  %p906_p12 = pnand %p905_p11, %p1027_p5 }
  0x16   : > { %800 = vmatprep.subr.bf16.mxu0 %v886_v1  ;;  %837 = vmatprep.subr.bf16.mxu1 %v886_v1  ;;  %s1050_s7 = scalar_lea.vmem %s1209_s0, %s736_s4  ;;  %s966_s28 = smov [#allocation2]  }
  0x17   : > { %v888_v4 = vld [vmem:[%s1050_s7] sm:$0xff]   ;;  %v890_v6 = vld [vmem:[%s1050_s7 + $0x8] sm:$0xff]   ;;  %v892_v8 = vld [vmem:[%s1050_s7 + $0x10] sm:$0xff]   ;;  %p907_p13 = pneg %p906_p12  ;;  %s908_s29 = sshll.u32 %s966_s28, 4  ;;  %s909_s29 = int_to_ptr.vmem [resolvable:$false] %s908_s29 }
  0x18   : > { %v889_v5 = vld [vmem:[%s1050_s7 + $0x40] sm:$0xff]   ;;  %804 = vmatprep.mubr.msk.bf16.mxu0 %vm312_vm1, %v888_v4  ;;  %v891_v7 = vld [vmem:[%s1050_s7 + $0x48] sm:$0xff]   ;;  %v893_v9 = vld [vmem:[%s1050_s7 + $0x50] sm:$0xff]   ;;  %s910_s30 = scalar_lea.vmem %s909_s29, 8192  ;;  %p911_p0 = scmp.lt.s32.totalorder %s1163_s20, %s909_s29 }
  0x19   : > { %801 = vmatpush3.bf16.msra.mxu0 %v886_v1  ;;  %840 = vmatpush3.bf16.msra.mxu1 %v886_v1  ;;  %v894_v10 = vld [vmem:[%s1050_s7 + $0x18] sm:$0xff]   ;;  %v896_v12 = vld [vmem:[%s1050_s7 + $0x20] sm:$0xff]   ;;  %v898_v14 = vld [vmem:[%s1050_s7 + $0x28] sm:$0xff]   ;;  %p912_p1 = scmp.lt.s32.totalorder %s910_s30, %s904_s27 }
  0x1a   : > { %802 = vmatprep.subr.bf16.mxu0 %v887_v3  ;;  %838 = vmatprep.subr.bf16.mxu1 %v887_v3  ;;  %v895_v11 = vld [vmem:[%s1050_s7 + $0x58] sm:$0xff]   ;;  %v897_v13 = vld [vmem:[%s1050_s7 + $0x60] sm:$0xff]   ;;  %v899_v15 = vld [vmem:[%s1050_s7 + $0x68] sm:$0xff]  }
  0x1b   : > { %820 = vmatprep.mubr.msk.bf16.mxu1 %vm312_vm1, %v889_v5  ;;  %v900_v16 = vld [vmem:[%s1050_s7 + $0x30] sm:$0xff]   ;;  %v902_v18 = vld [vmem:[%s1050_s7 + $0x38] sm:$0xff]   ;;  %p913_p2 = por %p912_p1, %p911_p0 }
  0x1c   : > { %v901_v17 = vld [vmem:[%s1050_s7 + $0x70] sm:$0xff]   ;;  %v903_v19 = vld [vmem:[%s1050_s7 + $0x78] sm:$0xff]  }
  0x1d   : > { %803 = vmatpush3.bf16.msra.mxu0 %v887_v3  ;;  %841 = vmatpush3.bf16.msra.mxu1 %v887_v3  ;;  %p914_p3 = pnand %p913_p2, %p907_p13 }
  0x20   : > { %805 = vmatmul.mubr.msk.bf16.vlgmr.msra.gmra.mxu0 %vm312_vm1, %v890_v6  ;;  %821 = vmatmul.mubr.msk.bf16.vlgmr.msra.gmra.mxu1 %vm312_vm1, %v891_v7 }
  0x21   : > { %808 = vmatprep.mubr.msk.bf16.mxu0 %vm312_vm1, %v892_v8  ;;  %824 = vmatprep.mubr.msk.bf16.mxu1 %vm312_vm1, %v893_v9 }
  0x28   : > { %809 = vmatmul.mubr.msk.bf16.gmra.mxu0 %vm312_vm1, %v894_v10  ;;  %825 = vmatmul.mubr.msk.bf16.gmra.mxu1 %vm312_vm1, %v895_v11 }
  0x29   : > { %812 = vmatprep.mubr.msk.bf16.mxu0 %vm312_vm1, %v896_v12  ;;  %828 = vmatprep.mubr.msk.bf16.mxu1 %vm312_vm1, %v897_v13 }
  0x30   : > { %813 = vmatmul.mubr.msk.bf16.gmra.mxu0 %vm312_vm1, %v898_v14  ;;  %829 = vmatmul.mubr.msk.bf16.gmra.mxu1 %vm312_vm1, %v899_v15 }
  0x31   : > { %816 = vmatprep.mubr.msk.bf16.mxu0 %vm312_vm1, %v900_v16  ;;  %832 = vmatprep.mubr.msk.bf16.mxu1 %vm312_vm1, %v901_v17 }
  0x38   : > { %817 = vmatmul.mubr.msk.bf16.gmra.mxu0 %vm312_vm1, %v902_v18  ;;  %833 = vmatmul.mubr.msk.bf16.gmra.mxu1 %vm312_vm1, %v903_v19 }
  0xe0   : > { %v806_v21 = vpop.f32.mrf.mxu0  ;;  %v822_v22 = vpop.f32.mrf.mxu1 }
  0xe1   : > { %v408_v23 = vadd.f32 %v806_v21, %v1088_v20  ;;  %v472_v24 = vadd.f32 %v822_v22, %v1088_v20 }
  0xe2   : > { %v399_v25 = vpop.f32.mrf.mxu0  ;;  %v463_v26 = vpop.f32.mrf.mxu1 }
  0xe3   : > { %vm528_vm2 = vcmp.ge.f32.partialorder %v408_v23, 0.0  ;;  %v560_v27 = vmul.f32 0.01, %v408_v23  ;;  %vm544_vm3 = vcmp.ge.f32.partialorder %v472_v24, 0.0  ;;  %v576_v28 = vmul.f32 0.01, %v472_v24 }
  0xe4   : > { %v400_v29 = vadd.f32 %v1088_v20, %v399_v25  ;;  %v464_v30 = vadd.f32 %v1088_v20, %v463_v26  ;;  %v807_v31 = vpop.f32.mrf.mxu0  ;;  %v823_v32 = vpop.f32.mrf.mxu1 }
  0xe5   : > { %v592_v33 = vsel %vm528_vm2, %v408_v23, %v560_v27  ;;  %v608_v34 = vsel %vm544_vm3, %v472_v24, %v576_v28  ;;  %v411_v35 = vadd.f32 %v807_v31, %v1088_v20  ;;  %v475_v36 = vadd.f32 %v823_v32, %v1088_v20 }
  0xe6   : > { %624 = vst [vmem:[%s1098_s17 + $0x10] sm:$0xff] %v592_v33  ;;  %640 = vst [vmem:[%s1098_s17 + $0x90] sm:$0xff] %v608_v34  ;;  %vm526_vm4 = vcmp.ge.f32.partialorder %v400_v29, 0.0  ;;  %v558_v37 = vmul.f32 0.01, %v400_v29  ;;  %vm542_vm5 = vcmp.ge.f32.partialorder %v464_v30, 0.0  ;;  %v402_v39 = vpop.f32.mrf.mxu0  ;;  %v466_v40 = vpop.f32.mrf.mxu1 }
  0xe7   : > { %v574_v38 = vmul.f32 0.01, %v464_v30  ;;  %vm529_vm6 = vcmp.ge.f32.partialorder %v411_v35, 0.0  ;;  %v561_v41 = vmul.f32 0.01, %v411_v35  ;;  %vm545_vm7 = vcmp.ge.f32.partialorder %v475_v36, 0.0 }
  0xe8   : > { %v577_v42 = vmul.f32 0.01, %v475_v36  ;;  %v590_v43 = vsel %vm526_vm4, %v400_v29, %v558_v37  ;;  %v403_v45 = vadd.f32 %v1088_v20, %v402_v39  ;;  %v467_v46 = vadd.f32 %v1088_v20, %v466_v40  ;;  %v810_v47 = vpop.f32.mrf.mxu0  ;;  %v826_v48 = vpop.f32.mrf.mxu1 }
  0xe9   : > { %v606_v44 = vsel %vm542_vm5, %v464_v30, %v574_v38  ;;  %622 = vst [vmem:[%s1098_s17] sm:$0xff] %v590_v43  ;;  %v593_v49 = vsel %vm529_vm6, %v411_v35, %v561_v41  ;;  %v424_v51 = vadd.f32 %v810_v47, %v1088_v20  ;;  %v488_v52 = vadd.f32 %v826_v48, %v1088_v20 }
  0xea   : > { %638 = vst [vmem:[%s1098_s17 + $0x80] sm:$0xff] %v606_v44  ;;  %v609_v50 = vsel %vm545_vm7, %v475_v36, %v577_v42  ;;  %625 = vst [vmem:[%s1098_s17 + $0x18] sm:$0xff] %v593_v49  ;;  %vm527_vm8 = vcmp.ge.f32.partialorder %v403_v45, 0.0  ;;  %v559_v53 = vmul.f32 0.01, %v403_v45  ;;  %vm543_vm9 = vcmp.ge.f32.partialorder %v467_v46, 0.0  ;;  %v415_v55 = vpop.f32.mrf.mxu0  ;;  %v479_v56 = vpop.f32.mrf.mxu1 }
  0xeb   : > { %641 = vst [vmem:[%s1098_s17 + $0x98] sm:$0xff] %v609_v50  ;;  %v575_v54 = vmul.f32 0.01, %v467_v46  ;;  %vm532_vm10 = vcmp.ge.f32.partialorder %v424_v51, 0.0  ;;  %v564_v57 = vmul.f32 0.01, %v424_v51  ;;  %v416_v61 = vadd.f32 %v1088_v20, %v415_v55 }
  0xec   : > { %vm548_vm11 = vcmp.ge.f32.partialorder %v488_v52, 0.0  ;;  %v580_v58 = vmul.f32 0.01, %v488_v52  ;;  %v591_v59 = vsel %vm527_vm8, %v403_v45, %v559_v53  ;;  %v480_v62 = vadd.f32 %v1088_v20, %v479_v56  ;;  %v811_v63 = vpop.f32.mrf.mxu0  ;;  %v827_v0 = vpop.f32.mrf.mxu1 }
  0xed   : > { %v607_v60 = vsel %vm543_vm9, %v467_v46, %v575_v54  ;;  %623 = vst [vmem:[%s1098_s17 + $0x8] sm:$0xff] %v591_v59  ;;  %v596_v1 = vsel %vm532_vm10, %v424_v51, %v564_v57  ;;  %v427_v3 = vadd.f32 %v811_v63, %v1088_v20  ;;  %v491_v4 = vadd.f32 %v827_v0, %v1088_v20 }
  0xee   : > { %639 = vst [vmem:[%s1098_s17 + $0x88] sm:$0xff] %v607_v60  ;;  %v612_v2 = vsel %vm548_vm11, %v488_v52, %v580_v58  ;;  %628 = vst [vmem:[%s1098_s17 + $0x30] sm:$0xff] %v596_v1  ;;  %vm530_vm12 = vcmp.ge.f32.partialorder %v416_v61, 0.0  ;;  %v562_v5 = vmul.f32 0.01, %v416_v61  ;;  %vm546_vm13 = vcmp.ge.f32.partialorder %v480_v62, 0.0  ;;  %v418_v7 = vpop.f32.mrf.mxu0  ;;  %v482_v8 = vpop.f32.mrf.mxu1 }
  0xef   : > { %644 = vst [vmem:[%s1098_s17 + $0xb0] sm:$0xff] %v612_v2  ;;  %v578_v6 = vmul.f32 0.01, %v480_v62  ;;  %vm533_vm14 = vcmp.ge.f32.partialorder %v427_v3, 0.0  ;;  %v565_v9 = vmul.f32 0.01, %v427_v3  ;;  %v419_v13 = vadd.f32 %v1088_v20, %v418_v7 }
  0xf0   : > { %vm549_vm15 = vcmp.ge.f32.partialorder %v491_v4, 0.0  ;;  %v581_v10 = vmul.f32 0.01, %v491_v4  ;;  %v594_v11 = vsel %vm530_vm12, %v416_v61, %v562_v5  ;;  %v483_v14 = vadd.f32 %v1088_v20, %v482_v8  ;;  %v814_v15 = vpop.f32.mrf.mxu0  ;;  %v830_v16 = vpop.f32.mrf.mxu1 }
  0xf1   : > { %v610_v12 = vsel %vm546_vm13, %v480_v62, %v578_v6  ;;  %626 = vst [vmem:[%s1098_s17 + $0x20] sm:$0xff] %v594_v11  ;;  %v597_v17 = vsel %vm533_vm14, %v427_v3, %v565_v9  ;;  %v440_v19 = vadd.f32 %v814_v15, %v1088_v20  ;;  %v504_v21 = vadd.f32 %v830_v16, %v1088_v20 }
  0xf2   : > { %642 = vst [vmem:[%s1098_s17 + $0xa0] sm:$0xff] %v610_v12  ;;  %v613_v18 = vsel %vm549_vm15, %v491_v4, %v581_v10  ;;  %629 = vst [vmem:[%s1098_s17 + $0x38] sm:$0xff] %v597_v17  ;;  %vm531_vm0 = vcmp.ge.f32.partialorder %v419_v13, 0.0  ;;  %v563_v22 = vmul.f32 0.01, %v419_v13  ;;  %vm547_vm1 = vcmp.ge.f32.partialorder %v483_v14, 0.0  ;;  %v431_v24 = vpop.f32.mrf.mxu0  ;;  %v495_v25 = vpop.f32.mrf.mxu1 }
  0xf3   : > { %645 = vst [vmem:[%s1098_s17 + $0xb8] sm:$0xff] %v613_v18  ;;  %v579_v23 = vmul.f32 0.01, %v483_v14  ;;  %vm536_vm2 = vcmp.ge.f32.partialorder %v440_v19, 0.0  ;;  %v568_v26 = vmul.f32 0.01, %v440_v19  ;;  %v432_v30 = vadd.f32 %v1088_v20, %v431_v24 }
  0xf4   : > { %vm552_vm3 = vcmp.ge.f32.partialorder %v504_v21, 0.0  ;;  %v584_v27 = vmul.f32 0.01, %v504_v21  ;;  %v595_v28 = vsel %vm531_vm0, %v419_v13, %v563_v22  ;;  %v496_v31 = vadd.f32 %v1088_v20, %v495_v25  ;;  %v815_v32 = vpop.f32.mrf.mxu0  ;;  %v831_v33 = vpop.f32.mrf.mxu1 }
  0xf5   : > { %v611_v29 = vsel %vm547_vm1, %v483_v14, %v579_v23  ;;  %627 = vst [vmem:[%s1098_s17 + $0x28] sm:$0xff] %v595_v28  ;;  %v600_v34 = vsel %vm536_vm2, %v440_v19, %v568_v26  ;;  %v443_v36 = vadd.f32 %v815_v32, %v1088_v20  ;;  %v507_v37 = vadd.f32 %v831_v33, %v1088_v20 }
  0xf6   : > { %643 = vst [vmem:[%s1098_s17 + $0xa8] sm:$0xff] %v611_v29  ;;  %v616_v35 = vsel %vm552_vm3, %v504_v21, %v584_v27  ;;  %632 = vst [vmem:[%s1098_s17 + $0x50] sm:$0xff] %v600_v34  ;;  %vm534_vm4 = vcmp.ge.f32.partialorder %v432_v30, 0.0  ;;  %v566_v38 = vmul.f32 0.01, %v432_v30  ;;  %vm550_vm5 = vcmp.ge.f32.partialorder %v496_v31, 0.0  ;;  %v434_v40 = vpop.f32.mrf.mxu0  ;;  %v498_v41 = vpop.f32.mrf.mxu1 }
  0xf7   : > { %648 = vst [vmem:[%s1098_s17 + $0xd0] sm:$0xff] %v616_v35  ;;  %v582_v39 = vmul.f32 0.01, %v496_v31  ;;  %vm537_vm6 = vcmp.ge.f32.partialorder %v443_v36, 0.0  ;;  %v569_v42 = vmul.f32 0.01, %v443_v36  ;;  %v435_v46 = vadd.f32 %v1088_v20, %v434_v40 }
  0xf8   : > { %vm553_vm7 = vcmp.ge.f32.partialorder %v507_v37, 0.0  ;;  %v585_v43 = vmul.f32 0.01, %v507_v37  ;;  %v598_v44 = vsel %vm534_vm4, %v432_v30, %v566_v38  ;;  %v499_v47 = vadd.f32 %v1088_v20, %v498_v41  ;;  %v818_v48 = vpop.f32.mrf.mxu0  ;;  %v834_v49 = vpop.f32.mrf.mxu1 }
  0xf9   : > { %v614_v45 = vsel %vm550_vm5, %v496_v31, %v582_v39  ;;  %630 = vst [vmem:[%s1098_s17 + $0x40] sm:$0xff] %v598_v44  ;;  %v601_v50 = vsel %vm537_vm6, %v443_v36, %v569_v42  ;;  %v456_v52 = vadd.f32 %v818_v48, %v1088_v20  ;;  %v520_v53 = vadd.f32 %v834_v49, %v1088_v20 }
  0xfa   : > { %646 = vst [vmem:[%s1098_s17 + $0xc0] sm:$0xff] %v614_v45  ;;  %v617_v51 = vsel %vm553_vm7, %v507_v37, %v585_v43  ;;  %633 = vst [vmem:[%s1098_s17 + $0x58] sm:$0xff] %v601_v50  ;;  %vm535_vm8 = vcmp.ge.f32.partialorder %v435_v46, 0.0  ;;  %v567_v54 = vmul.f32 0.01, %v435_v46  ;;  %vm551_vm9 = vcmp.ge.f32.partialorder %v499_v47, 0.0  ;;  %v447_v56 = vpop.f32.mrf.mxu0  ;;  %v511_v57 = vpop.f32.mrf.mxu1 }
  0xfb   : > { %649 = vst [vmem:[%s1098_s17 + $0xd8] sm:$0xff] %v617_v51  ;;  %v583_v55 = vmul.f32 0.01, %v499_v47  ;;  %vm540_vm10 = vcmp.ge.f32.partialorder %v456_v52, 0.0  ;;  %v572_v58 = vmul.f32 0.01, %v456_v52  ;;  %v448_v62 = vadd.f32 %v1088_v20, %v447_v56 }
  0xfc   : > { %vm556_vm11 = vcmp.ge.f32.partialorder %v520_v53, 0.0  ;;  %v588_v59 = vmul.f32 0.01, %v520_v53  ;;  %v599_v60 = vsel %vm535_vm8, %v435_v46, %v567_v54  ;;  %v512_v63 = vadd.f32 %v1088_v20, %v511_v57  ;;  %v819_v0 = vpop.f32.mrf.mxu0  ;;  %v835_v1 = vpop.f32.mrf.mxu1 }
  0xfd   : > { %v615_v61 = vsel %vm551_vm9, %v499_v47, %v583_v55  ;;  %631 = vst [vmem:[%s1098_s17 + $0x48] sm:$0xff] %v599_v60  ;;  %v604_v2 = vsel %vm540_vm10, %v456_v52, %v572_v58  ;;  %v459_v4 = vadd.f32 %v819_v0, %v1088_v20  ;;  %v523_v5 = vadd.f32 %v835_v1, %v1088_v20 }
  0xfe   : > { %647 = vst [vmem:[%s1098_s17 + $0xc8] sm:$0xff] %v615_v61  ;;  %v620_v3 = vsel %vm556_vm11, %v520_v53, %v588_v59  ;;  %636 = vst [vmem:[%s1098_s17 + $0x70] sm:$0xff] %v604_v2  ;;  %vm538_vm12 = vcmp.ge.f32.partialorder %v448_v62, 0.0  ;;  %v570_v6 = vmul.f32 0.01, %v448_v62  ;;  %vm554_vm13 = vcmp.ge.f32.partialorder %v512_v63, 0.0  ;;  %v450_v8 = vpop.f32.mrf.mxu0  ;;  %v514_v9 = vpop.f32.mrf.mxu1 }
  0xff   : > { %652 = vst [vmem:[%s1098_s17 + $0xf0] sm:$0xff] %v620_v3  ;;  %v586_v7 = vmul.f32 0.01, %v512_v63  ;;  %vm541_vm14 = vcmp.ge.f32.partialorder %v459_v4, 0.0  ;;  %v573_v10 = vmul.f32 0.01, %v459_v4  ;;  %v451_v14 = vadd.f32 %v1088_v20, %v450_v8 }
 0x100   : > { %vm557_vm15 = vcmp.ge.f32.partialorder %v523_v5, 0.0  ;;  %v589_v11 = vmul.f32 0.01, %v523_v5  ;;  %v602_v12 = vsel %vm538_vm12, %v448_v62, %v570_v6  ;;  %v515_v15 = vadd.f32 %v1088_v20, %v514_v9 }
 0x101   : > { %v618_v13 = vsel %vm554_vm13, %v512_v63, %v586_v7  ;;  %634 = vst [vmem:[%s1098_s17 + $0x60] sm:$0xff] %v602_v12  ;;  %v605_v16 = vsel %vm541_vm14, %v459_v4, %v573_v10  ;;  %vm539_vm0 = vcmp.ge.f32.partialorder %v451_v14, 0.0  ;;  %v571_v18 = vmul.f32 0.01, %v451_v14 }
 0x102   : > { %650 = vst [vmem:[%s1098_s17 + $0xe0] sm:$0xff] %v618_v13  ;;  %v621_v17 = vsel %vm557_vm15, %v523_v5, %v589_v11  ;;  %637 = vst [vmem:[%s1098_s17 + $0x78] sm:$0xff] %v605_v16  ;;  %vm555_vm1 = vcmp.ge.f32.partialorder %v515_v15, 0.0  ;;  %v587_v19 = vmul.f32 0.01, %v515_v15 }
 0x103   : > { %653 = vst [vmem:[%s1098_s17 + $0xf8] sm:$0xff] %v621_v17  ;;  %v603_v20 = vsel %vm539_vm0, %v451_v14, %v571_v18 }
 0x104   : > { %v619_v21 = vsel %vm555_vm1, %v515_v15, %v587_v19  ;;  %635 = vst [vmem:[%s1098_s17 + $0x68] sm:$0xff] %v603_v20 }
 0x105   : > { %651 = vst [vmem:[%s1098_s17 + $0xe8] sm:$0xff] %v619_v21 }
 0x106   : > { %917 = shalt.err (!%p914_p3)
}
 0x107   : > { %s918_s4 = scalar_lea.hbm %s1161_s25, 4096  ;;  %s922_s7 = scalar_lea.hbm %s1212_s3, 8192 }
 0x108   : > { %p919_p4 = scmp.ne.s32.totalorder %s1161_s25, %s918_s4  ;;  %p923_p9 = scmp.lt.s32.totalorder %s1161_s25, %s1212_s3 }
 0x109   : > { %p924_p10 = scmp.lt.s32.totalorder %s922_s7, %s918_s4 }
 0x10a   : > { %p920_p7 = pnand %p919_p4, %p1027_p5 }
 0x10b   : > { %p925_p11 = por %p924_p10, %p923_p9 }
 0x10c   : > { %p921_p8 = pneg %p920_p7 }
 0x10e   : > { %p926_p12 = pnand %p925_p11, %p921_p8 }
 0x110   : > { %929 = shalt.err (!%p926_p12)
}
 0x111   : > { %s967_s10 = smov 128   ;;  %s968_s11 = smov 8  }
 0x112   : > { %844 = dma.vmem_to_hbm [thread:$0]  (%p1027_p5), %s1163_s20, 4096, %s1161_s25, %s1169_s26, %s967_s10, %s967_s10, %s968_s11  }
 0x113 PF: > { %p850_p13 = scmp.ge.s32.totalorder %s964_s15, 2  ;;  %s683_s17 = sand.u32 1, %s952_s12  }
 0x114   : > { %s684_s19 = scalar_lea.sflag [#allocation3], %s683_s17 }
 0x115   : > { %p847_p0 = pnand %p850_p13, %p1031_p6 }
 0x117   : > { %p848_p1 = pneg %p847_p0 }
 0x119   : > { %947 = dma.done.wait (%p848_p1), %s684_s19, 4096  }
 0x11a   : > { %949 = vsyncadd (%p848_p1), %s684_s19, 4294963200  ;;  %p13_p2 = scmp.ge.s32.totalorder %s1014_s18, 4   ;;  %s1215_s12 = smov %s956_s13 }
 0x11b   : > { %s1216_s13 = smov %s960_s14  ;;  %s1217_s14 = smov %s1025_s21 }
 0x11c   : > { %s1218_s15 = smov %s1014_s18  ;;  %15 = sbr.rel (!%p13_p2) target bundleno = 3 (0x3), region = 67 }
 0x121   :  { %689 = vsyncpa [#allocation3], 1 }
 0x122   :  { %691 = vsyncpa [#allocation3 + $0x1], 1 }

</bundles_post_ra>
